<compile_context>
chip_gen: v7x
topology: tpu7x:2x2x1
jax: 0.10.0
libtpu: 0.0.40
codegen_flags: <defaults>
</compile_context>

<pallas_src>
import math

import jax
import jax.numpy as jnp
from jax.experimental import pallas as pl
from jax.experimental.pallas import tpu as pltpu


def _cdiv(a, b):
    return (a + b - 1) // b


def _round_up(v, m):
    return ((v + m - 1) // m) * m


def _choose_sub(TP, Cn, m, n):
    """Largest lane sub-tile (multiple of 128, divides TP) whose live f32
    working set (yall + x slice + out slice) fits in ~half the vreg file."""
    budget = 128 * 1024  # bytes
    for sub in (512, 256, 128):
        if TP % sub == 0 and (Cn + m + n) * sub * 4 <= budget:
            return sub
    return 128


def _make_cond_mul_kernel(n, C, TP, SUB):
    """Kernel factory (TP, SUB, n, C are static)."""
    num_sub = TP // SUB

    def kernel(x_ref, inds_ref, w2_ref, bcol_ref, o_ref):
        # x_ref:    (1, m, TP)  f32   input features for TP pixels (CHW layout)
        # inds_ref: (1, 1, TP)  int32 per-pixel class ids
        # w2_ref:   (C*n, m)    f32   all class weights (transposed), VMEM-resident
        # bcol_ref: (C*n, 1)    f32   all class biases, VMEM-resident
        # o_ref:    (1, n, TP)  f32   output features for the same TP pixels
        w2 = w2_ref[...]        # (C*n, m) -- hoisted, loaded once per grid step
        bcol = bcol_ref[...]    # (C*n, 1)

        def subtile(start):
            xs = x_ref[0, :, pl.ds(start, SUB)]        # (m, SUB)
            cls = inds_ref[0, :, pl.ds(start, SUB)]    # (1, SUB) int32
            # One wide MXU matmul: every class's output for this lane slice,
            # bias folded in via a lane broadcast of the (C*n, 1) column.
            yall = jnp.dot(w2, xs, preferred_element_type=jnp.float32)
            yall = yall + bcol                          # (C*n, SUB)
            # Per-pixel class selection with one-hot masks (C small & static,
            # unrolls into a handful of cheap VPU ops).
            out = jnp.zeros((n, SUB), jnp.float32)
            for c in range(C):
                m_c = (cls == c).astype(jnp.float32)            # (1, SUB)
                out = out + yall[c * n:(c + 1) * n, :] * m_c    # (n, SUB)
            o_ref[0, :, pl.ds(start, SUB)] = out.astype(o_ref.dtype)

        if num_sub == 1:
            subtile(0)
        else:
            def body(i, carry):
                subtile(pl.multiple_of(i * SUB, SUB))
                return carry
            jax.lax.fori_loop(0, num_sub, body, 0, unroll=True)

    return kernel


def _cond_mul_call(x3, inds3, w2, bcol, n, C, TP, SUB):
    """x3: (B, m, S_pad) f32, inds3: (B, 1, S_pad) i32, w2: (C*n, m), bcol: (C*n, 1)."""
    B, m, S_pad = x3.shape
    Cn = w2.shape[0]
    grid = (B, S_pad // TP)

    kernel = _make_cond_mul_kernel(n, C, TP, SUB)

    return pl.pallas_call(
        kernel,
        out_shape=jax.ShapeDtypeStruct((B, n, S_pad), x3.dtype),
        grid_spec=pl.GridSpec(
            grid=grid,
            in_specs=[
                pl.BlockSpec((1, m, TP), lambda bi, pi: (bi, 0, pi)),
                pl.BlockSpec((1, 1, TP), lambda bi, pi: (bi, 0, pi)),
                # Weights / bias: same block every step -> loaded into VMEM once.
                pl.BlockSpec((Cn, m), lambda bi, pi: (0, 0)),
                pl.BlockSpec((Cn, 1), lambda bi, pi: (0, 0)),
            ],
            out_specs=pl.BlockSpec((1, n, TP), lambda bi, pi: (bi, 0, pi)),
        ),
        compiler_params=pltpu.CompilerParams(
            # Both grid axes are independent -> shard across TCs on v7x.
            dimension_semantics=("parallel", "parallel"),
            # Plenty for 2x(x + out + inds) tiles + resident weights; safe on
            # v5e/v6e (128 MiB) and well under v7x's 64 MiB physical VMEM.
            vmem_limit_bytes=32 * 1024 * 1024,
        ),
    )(x3, inds3, w2, bcol)


def ref_cond_mul_forward(x, inds, w, b, *, tile_pixels=2048):
    """Reproduces RefCondMul.forward.

    x:    (B, m, *spatial)  (or (B, m))
    inds: any shape; inds.flatten() must follow the row order implied by
          x.transpose(1, -1).reshape(-1, m), i.e. (B, d_last, d2, ..., d_{k-1})
          for a k-D x (same implicit contract as the PyTorch reference).
    w:    (classes, m, n)
    b:    (classes, 1, n)
    returns (B, n, *spatial)
    """
    C, m, n = w.shape
    B = x.shape[0]
    spatial = tuple(x.shape[2:])
    S = 1
    for d in spatial:
        S *= d

    # Keep x in its native channels-first layout (no big HBM transpose).
    x3 = x.reshape(B, m, S)

    # Rearrange the (small, int32) class indices from the PyTorch flatten
    # order (B, d_last, d2, ..., d_{k-1}) into the native pixel order
    # (B, d2, ..., d_last) that the kernel iterates over.
    inds_flat = inds.reshape(-1).astype(jnp.int32)
    inds_flat = jnp.clip(inds_flat, 0, C - 1)     # guard out-of-range class ids
    if len(spatial) >= 2:
        inds_r = inds_flat.reshape((B, spatial[-1]) + spatial[:-1])
        inds_nat = jnp.moveaxis(inds_r, 1, -1).reshape(B, S)
    else:
        inds_nat = inds_flat.reshape(B, S)

    # Small wrapper-side weight reshapes (these stay VMEM-resident):
    #   w2[c*n + j, :] = w[c, :, j]      bcol[c*n + j, 0] = b[c, 0, j]
    w2 = jnp.transpose(w, (0, 2, 1)).reshape(C * n, m)
    bcol = b.reshape(C * n, 1)

    # ---- Tile-size selection (perf review items 1, 3, 5) -------------------
    # Balanced tile count so per-batch padding stays under ~one 128-px block,
    # with tiles up to `tile_pixels` wide to amortise per-grid-step overhead.
    num_tiles = max(1, _cdiv(S, tile_pixels))
    TP = max(128, _round_up(_cdiv(max(S, 1), num_tiles), 128))
    S_pad = _round_up(max(S, 1), TP)
    # v7x megacore: guarantee >= 2 grid steps when possible so both TCs work.
    if B * (S_pad // TP) < 2 and S_pad >= 256:
        TP = max(128, _round_up(_cdiv(S, 2), 128))
        S_pad = _round_up(S, TP)
    # In-kernel lane sub-tile keeping the (C*n, SUB) intermediate vreg-resident.
    SUB = _choose_sub(TP, C * n, m, n)

    if S_pad != S:
        x3 = jnp.pad(x3, ((0, 0), (0, 0), (0, S_pad - S)))
        inds_nat = jnp.pad(inds_nat, ((0, 0), (0, S_pad - S)))
    inds3 = inds_nat.reshape(B, 1, S_pad)

    out3 = _cond_mul_call(x3, inds3, w2, bcol, n, C, TP, SUB)[:, :, :S]

    if len(spatial) == 0:
        return out3.reshape(B, n)
    return out3.reshape((B, n) + spatial)


def _pure_jax_reference(x, inds, w, b):
    """Mirrors the PyTorch forward exactly (for correctness checks)."""
    C, m, n = w.shape
    xt = jnp.swapaxes(x, 1, x.ndim - 1)
    old_shape = list(xt.shape)
    xf = xt.reshape(-1, m)
    indsf = inds.reshape(-1).astype(jnp.int32)
    yf = jnp.einsum("pm,pmn->pn", xf, w[indsf]) + b[indsf, 0, :]
    old_shape[-1] = n
    y = yf.reshape(old_shape)
    return jnp.swapaxes(y, 1, y.ndim - 1)


if __name__ == "__main__":
    # Module hyper-parameters.
    classes = 4
    input_features = 32   # m
    output_features = 16  # n

    key = jax.random.PRNGKey(0)
    kx, kw, kb, ki, kx3, ki3 = jax.random.split(key, 6)

    # Parameter init matching torch.rand(...) * 2k - k, k = sqrt(1/m).
    k = math.sqrt(1.0 / float(input_features))
    w = jax.random.uniform(kw, (classes, input_features, output_features),
                           dtype=jnp.float32, minval=-k, maxval=k)
    b = jax.random.uniform(kb, (classes, 1, output_features),
                           dtype=jnp.float32, minval=-k, maxval=k)

    # --- Test 1: 2-D spatial (NCHW), inds flattened in (B, W, H) order ------
    B, H, W = 2, 8, 8
    x = jax.random.uniform(kx, (B, input_features, H, W), dtype=jnp.float32)
    inds = jax.random.randint(ki, (B, W, H), 0, classes, dtype=jnp.int32)

    out = jax.block_until_ready(ref_cond_mul_forward(x, inds, w, b))
    assert out.shape == (B, output_features, H, W), out.shape
    ref = _pure_jax_reference(x, inds, w, b)
    assert jnp.allclose(out, ref, atol=1e-4, rtol=1e-4), (
        float(jnp.max(jnp.abs(out - ref))))

    # --- Test 2: 3-D spatial, B=1 (exercises moveaxis path + megacore split) -
    B3, D1, D2, D3 = 1, 4, 6, 8
    x3 = jax.random.uniform(kx3, (B3, input_features, D1, D2, D3),
                            dtype=jnp.float32)
    # PyTorch flatten order for 5-D x is (B, D3, D1, D2).
    inds3 = jax.random.randint(ki3, (B3, D3, D1, D2), 0, classes,
                               dtype=jnp.int32)
    out3 = jax.block_until_ready(ref_cond_mul_forward(x3, inds3, w, b))
    assert out3.shape == (B3, output_features, D1, D2, D3), out3.shape
    ref3 = _pure_jax_reference(x3, inds3, w, b)
    assert jnp.allclose(out3, ref3, atol=1e-4, rtol=1e-4), (
        float(jnp.max(jnp.abs(out3 - ref3))))

    print("KERNEL_OK")
</pallas_src>

<mosaic_0001>
module attributes {stable_mosaic.version = 11 : i64} {
  func.func @kernel(%arg0: i32, %arg1: i32, %arg2: memref<1x32x128xf32, #tpu.memory_space<vmem>>, %arg3: memref<1x1x128xi32, #tpu.memory_space<vmem>>, %arg4: memref<64x32xf32, #tpu.memory_space<vmem>>, %arg5: memref<64x1xf32, #tpu.memory_space<vmem>>, %arg6: memref<1x16x128xf32, #tpu.memory_space<vmem>>) attributes {dimension_semantics = [#tpu.dimension_semantics<parallel>, #tpu.dimension_semantics<parallel>], iteration_bounds = array<i64: 2, 1>, scalar_prefetch = 0 : i64, scratch_operands = 0 : i64, tpu.core_type = #tpu.core_type<tc>, window_params = [{transform_indices = @transform_0, window_bounds = array<i64: 1, 32, 128>}, {transform_indices = @transform_1, window_bounds = array<i64: 1, 1, 128>}, {pipeline_mode = #tpu.pipeline_mode<synchronous>, transform_indices = @transform_2, window_bounds = array<i64: 64, 32>}, {pipeline_mode = #tpu.pipeline_mode<synchronous>, transform_indices = @transform_3, window_bounds = array<i64: 64, 1>}, {transform_indices = @transform_4, window_bounds = array<i64: 1, 16, 128>}]} {
    %c0 = arith.constant 0 : index
    %c0_0 = arith.constant 0 : index
    %0 = vector.load %arg4[%c0, %c0_0] : memref<64x32xf32, #tpu.memory_space<vmem>>, vector<64x32xf32>
    %c0_1 = arith.constant 0 : index
    %c0_2 = arith.constant 0 : index
    %1 = vector.load %arg5[%c0_1, %c0_2] : memref<64x1xf32, #tpu.memory_space<vmem>>, vector<64x1xf32>
    %c0_3 = arith.constant 0 : index
    %c0_4 = arith.constant 0 : index
    %c0_5 = arith.constant 0 : index
    %2 = vector.load %arg2[%c0_3, %c0_4, %c0_5] : memref<1x32x128xf32, #tpu.memory_space<vmem>>, vector<1x32x128xf32>
    %3 = vector.shape_cast %2 : vector<1x32x128xf32> to vector<32x128xf32>
    %c0_6 = arith.constant 0 : index
    %c0_7 = arith.constant 0 : index
    %c0_8 = arith.constant 0 : index
    %4 = vector.load %arg3[%c0_6, %c0_7, %c0_8] : memref<1x1x128xi32, #tpu.memory_space<vmem>>, vector<1x1x128xi32>
    %5 = vector.shape_cast %4 : vector<1x1x128xi32> to vector<1x128xi32>
    %cst = arith.constant dense<0.000000e+00> : vector<64x128xf32>
    %6 = tpu.matmul %0, %3, %cst {dimension_numbers = #tpu.dot_dimension_numbers<[1], [0], [0], [1], [0, 0, 1, 1], [], []>} : vector<64x32xf32>, vector<32x128xf32>, vector<64x128xf32> -> vector<64x128xf32>
    %7 = vector.broadcast %1 : vector<64x1xf32> to vector<64x128xf32>
    %8 = arith.addf %6, %7 : vector<64x128xf32>
    %cst_9 = arith.constant 0.000000e+00 : f32
    %9 = vector.broadcast %cst_9 : f32 to vector<16x128xf32>
    %c0_i32 = arith.constant 0 : i32
    %10 = vector.broadcast %c0_i32 : i32 to vector<1x128xi32>
    %11 = arith.cmpi eq, %5, %10 : vector<1x128xi32>
    %12 = arith.extui %11 : vector<1x128xi1> to vector<1x128xi32>
    %13 = arith.sitofp %12 : vector<1x128xi32> to vector<1x128xf32>
    %14 = vector.extract_strided_slice %8 {offsets = [0, 0], sizes = [16, 128], strides = [1, 1]} : vector<64x128xf32> to vector<16x128xf32>
    %15 = vector.broadcast %13 : vector<1x128xf32> to vector<16x128xf32>
    %16 = arith.mulf %14, %15 : vector<16x128xf32>
    %17 = arith.addf %9, %16 : vector<16x128xf32>
    %c1_i32 = arith.constant 1 : i32
    %18 = vector.broadcast %c1_i32 : i32 to vector<1x128xi32>
    %19 = arith.cmpi eq, %5, %18 : vector<1x128xi32>
    %20 = arith.extui %19 : vector<1x128xi1> to vector<1x128xi32>
    %21 = arith.sitofp %20 : vector<1x128xi32> to vector<1x128xf32>
    %22 = vector.extract_strided_slice %8 {offsets = [16, 0], sizes = [16, 128], strides = [1, 1]} : vector<64x128xf32> to vector<16x128xf32>
    %23 = vector.broadcast %21 : vector<1x128xf32> to vector<16x128xf32>
    %24 = arith.mulf %22, %23 : vector<16x128xf32>
    %25 = arith.addf %17, %24 : vector<16x128xf32>
    %c2_i32 = arith.constant 2 : i32
    %26 = vector.broadcast %c2_i32 : i32 to vector<1x128xi32>
    %27 = arith.cmpi eq, %5, %26 : vector<1x128xi32>
    %28 = arith.extui %27 : vector<1x128xi1> to vector<1x128xi32>
    %29 = arith.sitofp %28 : vector<1x128xi32> to vector<1x128xf32>
    %30 = vector.extract_strided_slice %8 {offsets = [32, 0], sizes = [16, 128], strides = [1, 1]} : vector<64x128xf32> to vector<16x128xf32>
    %31 = vector.broadcast %29 : vector<1x128xf32> to vector<16x128xf32>
    %32 = arith.mulf %30, %31 : vector<16x128xf32>
    %33 = arith.addf %25, %32 : vector<16x128xf32>
    %c3_i32 = arith.constant 3 : i32
    %34 = vector.broadcast %c3_i32 : i32 to vector<1x128xi32>
    %35 = arith.cmpi eq, %5, %34 : vector<1x128xi32>
    %36 = arith.extui %35 : vector<1x128xi1> to vector<1x128xi32>
    %37 = arith.sitofp %36 : vector<1x128xi32> to vector<1x128xf32>
    %38 = vector.extract_strided_slice %8 {offsets = [48, 0], sizes = [16, 128], strides = [1, 1]} : vector<64x128xf32> to vector<16x128xf32>
    %39 = vector.broadcast %37 : vector<1x128xf32> to vector<16x128xf32>
    %40 = arith.mulf %38, %39 : vector<16x128xf32>
    %41 = arith.addf %33, %40 : vector<16x128xf32>
    %c0_10 = arith.constant 0 : index
    %c0_11 = arith.constant 0 : index
    %c0_12 = arith.constant 0 : index
    %42 = vector.load %arg6[%c0_10, %c0_11, %c0_12] : memref<1x16x128xf32, #tpu.memory_space<vmem>>, vector<1x16x128xf32>
    %43 = vector.shape_cast %42 : vector<1x16x128xf32> to vector<16x128xf32>
    %44 = vector.shape_cast %41 : vector<16x128xf32> to vector<1x16x128xf32>
    tpu.vector_store %arg6[%c0_10, %c0_11, %c0_12], %44 {strides = array<i32>} : memref<1x16x128xf32, #tpu.memory_space<vmem>>, vector<1x16x128xf32>,
    return
  }
  func.func @transform_0(%arg0: i32, %arg1: i32) -> (i32, i32, i32) {
    %c0_i32 = arith.constant 0 : i32
    %c0_i32_0 = arith.constant 0 : i32
    return %arg0, %c0_i32, %arg1 : i32, i32, i32
  }
  func.func @transform_1(%arg0: i32, %arg1: i32) -> (i32, i32, i32) {
    %c0_i32 = arith.constant 0 : i32
    %c0_i32_0 = arith.constant 0 : i32
    return %arg0, %c0_i32, %arg1 : i32, i32, i32
  }
  func.func @transform_2(%arg0: i32, %arg1: i32) -> (i32, i32) {
    %c0_i32 = arith.constant 0 : i32
    %c0_i32_0 = arith.constant 0 : i32
    %c0_i32_1 = arith.constant 0 : i32
    return %c0_i32, %c0_i32_0 : i32, i32
  }
  func.func @transform_3(%arg0: i32, %arg1: i32) -> (i32, i32) {
    %c0_i32 = arith.constant 0 : i32
    %c0_i32_0 = arith.constant 0 : i32
    %c0_i32_1 = arith.constant 0 : i32
    return %c0_i32, %c0_i32_0 : i32, i32
  }
  func.func @transform_4(%arg0: i32, %arg1: i32) -> (i32, i32, i32) {
    %c0_i32 = arith.constant 0 : i32
    %c0_i32_0 = arith.constant 0 : i32
    return %arg0, %c0_i32, %arg1 : i32, i32, i32
  }
}

</mosaic_0001>

<bundles_post_ra>
// kernel: tpu_custom_call.1
= control target key start
LH: loop header
LB: loop body
LE: loop exit
PB: predicated region body
PF: predicated region fallthrough
CT: control target
= control target key end

     0   :  { %9 = vsyncpa [#allocation3], 0  ;;  %s1020_s0 = inlined_call_operand.vmem [shape: f32[2,32,128], index: 0, kind: input, shape index: {}]   ;;  %s1021_s1 = inlined_call_operand.vmem [shape: s32[2,1,128], index: 1, kind: input, shape index: {}]   ;;  %s1022_s2 = inlined_call_operand.vmem [shape: f32[64,32], index: 2, kind: input, shape index: {}]   ;;  %s1023_s3 = inlined_call_operand.vmem [shape: f32[64,1], index: 3, kind: input, shape index: {}]   ;;  %s1024_s4 = inlined_call_operand.hbm [shape: f32[2,16,128], index: 4, kind: output, shape index: {}]  }
   0x1   :  { %11 = vsyncpa [#allocation3 + $0x1], 0  ;;  %s838_s15 = smov 0   ;;  %s840_s16 = smov 0  }
   0x2   :  { %s842_s17 = smov 0   ;;  %s844_s18 = smov 0  }
   0x3   :  { %s846_s19 = smov 0   ;;  %s848_s20 = smov 0  }
   0x4 LB: > { %s596_s21 = sadd.s32 4294967295, %s806_s20   ;;  %s597_s22 = sadd.s32 4294967294, %s806_s20   ;;  %s806_s20 = sphi %s848_s20, %s17_s20   ;;  %s802_s19 = sphi %s846_s19, %s1031_s19   ;;  %s798_s18 = sphi %s844_s18, %s1030_s18   ;;  %s794_s17 = sphi %s842_s17, %s1029_s17   ;;  %s790_s16 = sphi %s840_s16, %s1028_s16   ;;  %s786_s15 = sphi %s838_s15, %s1027_s15  }
   0x5   : > { %s29_s23 = sadd.s32 1, %s802_s19  ;;  %s136_s24 = sadd.s32 1, %s794_s17 }
   0x6   : > { %p31_p0 = scmp.ge.s32.totalorder %s29_s23, 2  ;;  %p146_p1 = scmp.ne.s32.totalorder %s794_s17, %s790_s16 }
   0x7   : > { %p147_p2 = scmp.eq.s32.totalorder %s596_s21, 1  ;;  %p152_p3 = scmp.ne.s32.totalorder %s790_s16, %s786_s15 }
   0x8   : > { %s1033_s23 = smov (%p31_p0, %s29_s23), 0  ;;  %p153_p5 = scmp.eq.s32.totalorder %s597_s22, 1 }
   0x9   : > { %p878_p4 = por %p147_p2, %p146_p1  ;;  %s131_s26 = ssub.s32 %s802_s19, %s1033_s23 }
   0xa   : > { %p600_p6 = scmp.ge.s32.totalorder %s806_s20, 1  ;;  %p134_p7 = scmp.eq.s32.totalorder %s131_s26, 0 }
   0xb   : > { %p885_p8 = por %p153_p5, %p152_p3  ;;  %p197_p9 = scmp.lt.s32.totalorder %s806_s20, 3 }
   0xc   : > { %s891_s28 = scalar_select %p134_p7, %s794_s17, %s136_s24  }
   0xd   : > { %p198_p10 = pnand %p600_p6, %p197_p9 }
   0xe   : > { %p232_p11 = scmp.lt.s32.totalorder (!%p198_p10), %s798_s18, 1  ;;  %v246_v0 = vld [vmem:[%s1022_s2] sm:$0xff] (!%p198_p10)  ;;  %vm307_vm0 = vcmask (!%p198_p10), 261120   ;;  %v808_v2 = vmov (!%p198_p10), 0   ;;  %v256_v3 = vld [vmem:[%s1023_s3 + $0x10] sm:$0xff] (!%p198_p10)  ;;  %v257_v5 = vld [vmem:[%s1023_s3 + $0x18] sm:$0xff] (!%p198_p10)  ;;  %v441_v25 = vlaneseq (!%p198_p10) }
   0xf   : > { %201 = sbr.rel (%p198_p10) target bundleno = 279 (0x117), region = 36  ;;  %v250_v1 = vld [vmem:[%s1022_s2 + $0x20] sm:$0xff] (!%p198_p10)  ;;  %643 = vmatprep.mubr.msk.f32.mxu0 (!%p198_p10), %vm307_vm0, %v246_v0  ;;  %727 = vset.pattern.permute.xlu1 (!%p198_p10), %v808_v2  ;;  %v255_v6 = vld [vmem:[%s1023_s3 + $0x8] sm:$0xff] (!%p198_p10)  ;;  %v261_v15 = vld [vmem:[%s1023_s3 + $0x38] sm:$0xff] (!%p198_p10)  ;;  %v809_v31 = vmov (!%p198_p10), 0.0   ;;  %s622_s22 = sshll.u32 (!%p198_p10), %s798_s18, 8 }
  0x10   : > { %649 = vmatprep.mubr.msk.f32.mxu1 (!%p198_p10), %vm307_vm0, %v250_v1  ;;  %726 = vset.pattern.permute.xlu0 (!%p198_p10), %v808_v2  ;;  %v254_v4 = vld [vmem:[%s1023_s3] sm:$0xff] (!%p198_p10)  ;;  %v259_v13 = vld [vmem:[%s1023_s3 + $0x28] sm:$0xff] (!%p198_p10)  ;;  %v260_v16 = vld [vmem:[%s1023_s3 + $0x30] sm:$0xff] (!%p198_p10)  ;;  %v442_v29 = vshrl.u32 (!%p198_p10), %v441_v25, 7  ;;  %s970_s29 = scalar_lea.hbm (!%p198_p10), %s1024_s4, %s622_s22  ;;  %s810_s5 = smov (!%p198_p10), [#allocation2]  }
  0x11   : > { %279 = vperm.xlu1 (!%p198_p10), %727, %v256_v3   ;;  %269 = vperm.xlu0 (!%p198_p10), %726, %v254_v4   ;;  %v258_v14 = vld [vmem:[%s1023_s3 + $0x20] sm:$0xff] (!%p198_p10)  ;;  %v247_v17 = vld [vmem:[%s1022_s2 + $0x8] sm:$0xff] (!%p198_p10)  ;;  %v248_v19 = vld [vmem:[%s1022_s2 + $0x10] sm:$0xff] (!%p198_p10)  ;;  %s732_s6 = sshll.u32 (!%p198_p10), %s810_s5, 4  ;;  %s733_s6 = int_to_ptr.vmem [resolvable:$false] %s732_s6 }
  0x12   : > { %v251_v18 = vld [vmem:[%s1022_s2 + $0x28] sm:$0xff] (!%p198_p10)  ;;  %v252_v20 = vld [vmem:[%s1022_s2 + $0x30] sm:$0xff] (!%p198_p10)  ;;  %v249_v21 = vld [vmem:[%s1022_s2 + $0x18] sm:$0xff] (!%p198_p10)  ;;  %v443_v30 = vsub.s32 (!%p198_p10), 0, %v442_v29  ;;  %s734_s8 = scalar_lea.vmem (!%p198_p10), %s733_s6, 512 }
  0x13   : > { %v253_v22 = vld [vmem:[%s1022_s2 + $0x38] sm:$0xff] (!%p198_p10) }
  0x15   : > { %284 = vperm.xlu1 (!%p198_p10), %727, %v257_v5   ;;  %274 = vperm.xlu0 (!%p198_p10), %726, %v255_v6  }
  0x16   : > { %s903_s7 = scalar_select %p232_p11, %s798_s18, 1 }
  0x18   : > { %s621_s12 = sshll.u32 %s903_s7, 5 }
  0x19   : > { %s239_s24 = scalar_lea.vmem %s1020_s0, %s621_s12  ;;  %294 = vperm.xlu1 %727, %v259_v13   ;;  %289 = vperm.xlu0 %726, %v258_v14   ;;  %s245_s12 = scalar_lea.vmem %s1021_s1, %s903_s7 }
  0x1a   : > { %v262_v7 = vld [vmem:[%s239_s24] sm:$0xff]  ;;  %v263_v8 = vld [vmem:[%s239_s24 + $0x8] sm:$0xff]  ;;  %v264_v9 = vld [vmem:[%s239_s24 + $0x10] sm:$0xff]  ;;  %s229_s7 = sand.u32 1, %s790_s16  }
  0x1b   : > { %v655_v10 = vpack.c.bf16 %v263_v8, %v262_v7  ;;  %v265_v11 = vld [vmem:[%s239_s24 + $0x18] sm:$0xff]  ;;  %v266_v26 = vld [vmem:[%s245_s12] sm:$0x1]  ;;  %s601_s13 = sshll.u32 %s229_s7, 4  ;;  %s974_s30 = scalar_lea.sflag [#allocation3], %s229_s7 }
  0x1c   : > { %v659_v12 = vpack.c.bf16 %v265_v11, %v264_v9  ;;  %vm437_vm1 = vcmp.eq.s32.totalorder %v266_v26, 0  ;;  %vm463_vm2 = vcmp.eq.s32.totalorder %v266_v26, 2  ;;  %vm450_vm3 = vcmp.eq.s32.totalorder %v266_v26, 1  ;;  %s231_s14 = scalar_lea.vmem [#allocation2], %s601_s13 }
  0x1d   : > { %656 = vmatprep.subr.bf16.mxu0 %v655_v10  ;;  %663 = vmatprep.subr.bf16.mxu1 %v655_v10  ;;  %v612_v32 = vsel %vm437_vm1, 1.0, %v809_v31  ;;  %v614_v33 = vsel %vm463_vm2, 1.0, %v809_v31  ;;  %vm476_vm4 = vcmp.eq.s32.totalorder %v266_v26, 3  ;;  %v613_v40 = vsel %vm450_vm3, 1.0, %v809_v31  ;;  %s506_s21 = sshll.u32 %s231_s14, 4  ;;  %s965_s21 = int_to_ptr.vmem [resolvable:$true] %s506_s21 }
  0x1e   : > { %658 = vmatpush3.bf16.msra.mxu0 %v655_v10  ;;  %665 = vmatpush3.bf16.msra.mxu1 %v655_v10  ;;  %v444_v36 = vrot.slane %v612_v32, %v443_v30  ;;  %v470_v37 = vrot.slane %v614_v33, %v443_v30  ;;  %v615_v41 = vsel %vm476_vm4, 1.0, %v809_v31  ;;  %v457_v52 = vrot.slane %v613_v40, %v443_v30  ;;  %s728_s18 = scalar_lea.vmem %s965_s21, 256  ;;  %p735_p1 = scmp.lt.s32.totalorder %s965_s21, %s733_s6 }
  0x1f   : > { %660 = vmatprep.subr.bf16.mxu0 %v659_v12  ;;  %664 = vmatprep.subr.bf16.mxu1 %v659_v12  ;;  %v483_v53 = vrot.slane %v615_v41, %v443_v30  ;;  %p729_p12 = scmp.ne.s32.totalorder %s965_s21, %s728_s18  ;;  %p736_p2 = scmp.lt.s32.totalorder %s734_s8, %s728_s18 }
  0x20   : > { %304 = vperm.xlu1 %727, %v261_v15   ;;  %299 = vperm.xlu0 %726, %v260_v16  }
  0x21   : > { %p730_p13 = pnand %p729_p12, %p878_p4  ;;  %p737_p3 = por %p736_p2, %p735_p1 }
  0x22   : > { %662 = vmatpush3.bf16.msra.mxu0 %v659_v12  ;;  %666 = vmatpush3.bf16.msra.mxu1 %v659_v12 }
  0x23   : > { %p731_p0 = pneg %p730_p13 }
  0x25   : > { %644 = vmatmul.mubr.msk.f32.vlgmr.msra.gmra.mrb[0].mxu0 %vm307_vm0, %v247_v17  ;;  %650 = vmatmul.mubr.msk.f32.vlgmr.msra.gmra.mrb[0].mxu1 %vm307_vm0, %v251_v18  ;;  %p738_p5 = pnand %p737_p3, %p731_p0 }
  0x26   : > { %646 = vmatprep.mubr.msk.f32.mxu0 %vm307_vm0, %v248_v19  ;;  %652 = vmatprep.mubr.msk.f32.mxu1 %vm307_vm0, %v252_v20 }
  0x29   : > { %647 = vmatmul.mubr.msk.f32.gmra.mrb[2].mxu0 %vm307_vm0, %v249_v21  ;;  %653 = vmatmul.mubr.msk.f32.gmra.mrb[2].mxu1 %vm307_vm0, %v253_v22 }
  0x90   : > { %v280_v23 = vpop.permute.xlu1 %279  ;;  %v270_v24 = vpop.permute.xlu0 %269 }
  0x94   : > { %v285_v27 = vpop.permute.xlu1 %284  ;;  %v275_v28 = vpop.permute.xlu0 %274 }
  0x98   : > { %v295_v34 = vpop.permute.xlu1 %294  ;;  %v290_v35 = vpop.permute.xlu0 %289 }
  0x9f   : > { %v305_v48 = vpop.permute.xlu1 %304  ;;  %v300_v49 = vpop.permute.xlu0 %299 }
  0xf8   : > { %v645_v38 = vpop.f32.mrb[0].mxu0  ;;  %v651_v39 = vpop.f32.mrb[0].mxu1 }
  0xf9   : > { %v404_v42 = vadd.f32 %v645_v38, %v275_v28  ;;  %v424_v43 = vadd.f32 %v651_v39, %v295_v34  ;;  %v398_v44 = vpop.f32.mrb[1].mxu0  ;;  %v418_v45 = vpop.f32.mrb[1].mxu1 }
  0xfa   : > { %v399_v46 = vadd.f32 %v398_v44, %v270_v24  ;;  %v419_v47 = vadd.f32 %v418_v45, %v290_v35 }
  0xfb   : > { %v447_v50 = vmul.f32 %v444_v36, %v404_v42  ;;  %v473_v51 = vmul.f32 %v470_v37, %v424_v43 }
  0xfc   : > { %v446_v54 = vmul.f32 %v444_v36, %v399_v46  ;;  %v472_v55 = vmul.f32 %v470_v37, %v419_v47  ;;  %v648_v56 = vpop.f32.mrb[2].mxu0  ;;  %v654_v57 = vpop.f32.mrb[2].mxu1 }
  0xfd   : > { %v414_v58 = vadd.f32 %v648_v56, %v285_v27  ;;  %v434_v59 = vadd.f32 %v654_v57, %v305_v48  ;;  %v408_v60 = vpop.f32.mrb[3].mxu0  ;;  %v428_v61 = vpop.f32.mrb[3].mxu1 }
  0xfe   : > { %v409_v62 = vadd.f32 %v408_v60, %v280_v23  ;;  %v429_v63 = vadd.f32 %v428_v61, %v300_v49 }
  0xff   : > { %v460_v0 = vmul.f32 %v457_v52, %v414_v58  ;;  %v486_v1 = vmul.f32 %v483_v53, %v434_v59 }
 0x100   : > { %v459_v2 = vmul.f32 %v457_v52, %v409_v62  ;;  %v485_v3 = vmul.f32 %v483_v53, %v429_v63 }
 0x101   : > { %v462_v4 = vadd.f32 %v460_v0, %v447_v50 }
 0x102   : > { %v461_v5 = vadd.f32 %v459_v2, %v446_v54 }
 0x103   : > { %v475_v6 = vadd.f32 %v473_v51, %v462_v4 }
 0x104   : > { %v474_v7 = vadd.f32 %v472_v55, %v461_v5 }
 0x105   : > { %v488_v8 = vadd.f32 %v486_v1, %v475_v6 }
 0x106   : > { %v487_v9 = vadd.f32 %v485_v3, %v474_v7 }
 0x107   : > { %490 = vst [vmem:[%s231_s14 + $0x8] sm:$0xff] %v488_v8 }
 0x108   : > { %489 = vst [vmem:[%s231_s14] sm:$0xff] %v487_v9 }
 0x109   : > { %741 = shalt.err (!%p738_p5)
}
 0x10a   : > { %s742_s9 = scalar_lea.hbm %s970_s29, 256  ;;  %s746_s12 = scalar_lea.hbm %s1024_s4, 512 }
 0x10b   : > { %p743_p6 = scmp.ne.s32.totalorder %s970_s29, %s742_s9  ;;  %p747_p10 = scmp.lt.u32.totalorder %s970_s29, %s1024_s4 }
 0x10c   : > { %p748_p11 = scmp.lt.u32.totalorder %s746_s12, %s742_s9  ;;  %p750_p13 = scmp.lt.u32.totalorder %s742_s9, %s970_s29 }
 0x10d   : > { %p744_p7 = pnand %p743_p6, %p878_p4 }
 0x10e   : > { %p749_p12 = por %p748_p11, %p747_p10 }
 0x10f   : > { %p745_p9 = pneg %p744_p7 }
 0x110   : > { %p751_p0 = por %p750_p13, %p749_p12 }
 0x112   : > { %p752_p1 = pnand %p751_p0, %p745_p9 }
 0x114   : > { %755 = shalt.err (!%p752_p1)
}
 0x115   : > { %s811_s14 = smov 128   ;;  %s812_s22 = smov 8  }
 0x116   : > { %667 = dma.vmem_to_hbm [thread:$0]  (%p878_p4), %s965_s21, 256, %s970_s29, %s974_s30, %s811_s14, %s811_s14, %s812_s22  }
 0x117 PF: > { %p673_p2 = scmp.ge.s32.totalorder %s806_s20, 2  ;;  %s521_s24 = sand.u32 1, %s786_s15  }
 0x118   : > { %s522_s26 = scalar_lea.sflag [#allocation3], %s521_s24 }
 0x119   : > { %p670_p3 = pnand %p673_p2, %p885_p8 }
 0x11b   : > { %781 = dma.done.wait (!%p670_p3), %s522_s26, 256  }
 0x11c   : > { %783 = vsyncadd (!%p670_p3), %s522_s26, 4294967040  ;;  %s17_s20 = sadd.s32 1, %s806_s20   ;;  %s1027_s15 = smov %s790_s16 }
 0x11d   : > { %p14_p5 = scmp.ge.s32.totalorder %s17_s20, 4   ;;  %s1028_s16 = smov %s794_s17 }
 0x11e   : > { %s1029_s17 = smov %s891_s28  ;;  %s1030_s18 = smov %s802_s19 }
 0x11f   : > { %s1031_s19 = smov %s1033_s23  ;;  %16 = sbr.rel (!%p14_p5) target bundleno = 4 (0x4), region = 74 }
 0x126   :  { %527 = vsyncpa [#allocation3], 1 }
 0x127   :  { %529 = vsyncpa [#allocation3 + $0x1], 1 }

</bundles_post_ra>
